<compile_context>
chip_gen: v5e
topology: v5e:2x2
jax: 0.10.0
libtpu: 0.0.40
codegen_flags: <defaults>
</compile_context>

<pallas_src>
import jax
import jax.numpy as jnp
from jax.experimental import pallas as pl
from jax.experimental.pallas import tpu as pltpu

_SUBLANE = 8  # f32 sublane height


def _round_up(n: int, m: int) -> int:
    return ((n + m - 1) // m) * m


# ---------------------------------------------------------------------------
# Kernel: one batch tile of  y = tanh(x @ W1 + b1) @ W2 + b2
# ---------------------------------------------------------------------------
def _forward_kernel(x_ref, w1_ref, b1_ref, w2_ref, b2_ref, out_ref):
    w1 = w1_ref[...]
    w2 = w2_ref[...]
    # MXU matmuls in the weights' dtype (f32 or pre-cast bf16), f32 accumulation.
    h = jnp.dot(x_ref[...].astype(w1.dtype), w1,
                preferred_element_type=jnp.float32)
    h = jnp.tanh(h + b1_ref[...].astype(jnp.float32))        # f32 VPU add + EUP tanh
    y = jnp.dot(h.astype(w2.dtype), w2,
                preferred_element_type=jnp.float32)
    out_ref[...] = (y + b2_ref[...].astype(jnp.float32)).astype(out_ref.dtype)


# ---------------------------------------------------------------------------
# Wrappers
# ---------------------------------------------------------------------------
def cast_params_for_mxu(w1, b1, w2, b2, matmul_dtype=jnp.bfloat16):
    """One-time cast of the weight matrices for the MXU (bf16 is native on
    v5e/v6e/v7x).  Biases stay f32 (bias add + tanh run in f32 everywhere).
    Call this once at parameter-load time, not per forward."""
    return (w1.astype(matmul_dtype), b1.astype(jnp.float32),
            w2.astype(matmul_dtype), b2.astype(jnp.float32))


def _pick_tile(batch: int, block_batch: int) -> int:
    tb = _round_up(min(block_batch, batch), _SUBLANE)
    # Ensure >=2 grid steps when possible so both v7x TensorCores get work.
    half = max(_SUBLANE, _round_up(pl.cdiv(batch, 2), _SUBLANE))
    return min(tb, half)


def single_gaussian_decoder_forward(x, w1, b1, w2, b2, *, block_batch=1024,
                                    out_dtype=None):
    """SingleGaussianDecoder.forward.

    x: (B, d_in); w1: (d_in, H); b1: (H,); w2: (H, d_out); b2: (d_out,).
    Pass bf16 x (and weights via cast_params_for_mxu) to halve HBM traffic on
    bandwidth-bound shapes; accumulation is always f32."""
    B, d_in = x.shape
    d_in_w, H = w1.shape
    assert d_in_w == d_in, "w1 must be (d_in, hidden)"
    H2, d_out = w2.shape
    assert H2 == H, "w2 must be (hidden, d_out)"
    out_dtype = x.dtype if out_dtype is None else out_dtype

    # (H,) -> (1, H): metadata-only reshape, keeps the kernel refs 2-D.
    b1_2d = b1.reshape(1, H)
    b2_2d = b2.reshape(1, d_out)

    tb = _pick_tile(B, block_batch)
    grid = (pl.cdiv(B, tb),)

    def resident(shape):
        # Same block index every grid step -> DMA'd once, stays VMEM-resident
        # while the batch tiles pipeline.
        return pl.BlockSpec(shape, lambda i: (0, 0))

    itemsize = lambda a: jnp.dtype(a.dtype).itemsize
    cost = pl.CostEstimate(
        flops=2 * B * (d_in * H + H * d_out),
        transcendentals=B * H,
        bytes_accessed=(B * d_in * itemsize(x)
                        + B * d_out * jnp.dtype(out_dtype).itemsize
                        + d_in * H * itemsize(w1) + H * d_out * itemsize(w2)
                        + H * itemsize(b1) + d_out * itemsize(b2)),
    )

    return pl.pallas_call(
        _forward_kernel,
        out_shape=jax.ShapeDtypeStruct((B, d_out), out_dtype),
        grid=grid,
        in_specs=[
            pl.BlockSpec((tb, d_in), lambda i: (i, 0)),   # x: tiled over batch
            resident((d_in, H)),                          # w1
            resident((1, H)),                             # b1
            resident((H, d_out)),                         # w2
            resident((1, d_out)),                         # b2
        ],
        out_specs=pl.BlockSpec((tb, d_out), lambda i: (i, 0)),
        compiler_params=pltpu.CompilerParams(
            dimension_semantics=("parallel",),            # batch tiles across TCs
        ),
        cost_estimate=cost,
    )(x, w1, b1_2d, w2, b2_2d)


def get_mean_variance(x, w1, b1, w2, b2, log_std, *, block_batch=1024,
                      out_dtype=None):
    """SingleGaussianDecoder.get_mean_variance: (mean, ones_like(mean) * log_std).
    The log_std broadcast is constant data, so it is left to XLA (fused/deferred)
    instead of doubling the kernel's HBM writeback."""
    mean = single_gaussian_decoder_forward(x, w1, b1, w2, b2,
                                           block_batch=block_batch,
                                           out_dtype=out_dtype)
    return mean, jnp.broadcast_to(log_std.astype(mean.dtype), mean.shape)


def compute_loss(features, red_locs, w1, b1, w2, b2, log_std, *, block_batch=1024):
    """SingleGaussianDecoder.compute_loss: -mean_batch( sum_dims Normal.log_prob ).
    Distribution glue in plain JAX around the Pallas forward."""
    # TODO(synk): the Normal log-prob reduction stays in plain JAX (no kernel needed).
    mean = single_gaussian_decoder_forward(features, w1, b1, w2, b2,
                                           block_batch=block_batch,
                                           out_dtype=jnp.float32)
    log_std_b = jnp.broadcast_to(log_std.astype(jnp.float32), mean.shape)
    var = jnp.exp(2.0 * log_std_b)
    logprob = (-0.5 * (red_locs - mean) ** 2 / var
               - log_std_b - 0.5 * jnp.log(2.0 * jnp.pi))
    return -jnp.mean(jnp.sum(logprob, axis=1))


# ---------------------------------------------------------------------------
# Self-test
# ---------------------------------------------------------------------------
if __name__ == "__main__":
    batch, input_dim, hidden_dim, output_dim = 8, 32, 32, 8
    log_std_init = 0.0

    key = jax.random.PRNGKey(0)
    kx, kw1, kb1, kw2, kb2, kxl, kr = jax.random.split(key, 7)

    x = jax.random.normal(kx, (batch, input_dim), dtype=jnp.float32)
    bound1 = 1.0 / (input_dim ** 0.5)
    w1 = jax.random.uniform(kw1, (input_dim, hidden_dim), jnp.float32, -bound1, bound1)
    b1 = jax.random.uniform(kb1, (hidden_dim,), jnp.float32, -bound1, bound1)
    bound2 = 1.0 / (hidden_dim ** 0.5)
    w2 = jax.random.uniform(kw2, (hidden_dim, output_dim), jnp.float32, -bound2, bound2)
    b2 = jax.random.uniform(kb2, (output_dim,), jnp.float32, -bound2, bound2)
    log_std = jnp.ones((output_dim,), jnp.float32) * log_std_init

    def ref_fwd(xv):
        return jnp.tanh(xv @ w1 + b1) @ w2 + b2

    # 1) Small batch (single grid step), f32 everywhere, natural feature widths.
    out = jax.block_until_ready(single_gaussian_decoder_forward(x, w1, b1, w2, b2))
    assert out.shape == (batch, output_dim)
    assert jnp.allclose(out, ref_fwd(x), atol=1e-5, rtol=1e-5), "forward mismatch"

    # 2) get_mean_variance (log_std broadcast handled by XLA, not the kernel).
    mean, log_std_b = get_mean_variance(x, w1, b1, w2, b2, log_std)
    jax.block_until_ready((mean, log_std_b))
    assert mean.shape == (batch, output_dim) and log_std_b.shape == mean.shape
    assert jnp.allclose(mean, ref_fwd(x), atol=1e-5, rtol=1e-5), "mean mismatch"
    assert jnp.allclose(log_std_b, jnp.ones_like(mean) * log_std, atol=1e-6), "log_std mismatch"

    # 3) Large batch, explicit small tile -> 4 grid steps with a ragged last block.
    big_b = 1000
    xl = jax.random.normal(kxl, (big_b, input_dim), dtype=jnp.float32)
    out_big = jax.block_until_ready(
        single_gaussian_decoder_forward(xl, w1, b1, w2, b2, block_batch=256))
    assert out_big.shape == (big_b, output_dim)
    assert jnp.allclose(out_big, ref_fwd(xl), atol=1e-4, rtol=1e-4), "tiled forward mismatch"

    # 4) Default tiling path: tb capped at ceil(B/2) -> exactly 2 grid steps
    #    (both v7x TensorCores busy), second block partial.
    out_big2 = jax.block_until_ready(
        single_gaussian_decoder_forward(xl, w1, b1, w2, b2))
    assert jnp.allclose(out_big2, ref_fwd(xl), atol=1e-4, rtol=1e-4), "split-tile mismatch"

    # 5) bf16 path: weights cast ONCE, activations fed as bf16 (halves HBM read);
    #    f32 accumulation inside the kernel.  Loose tolerance.
    w1b, b1b, w2b, b2b = cast_params_for_mxu(w1, b1, w2, b2, jnp.bfloat16)
    out_bf16 = jax.block_until_ready(
        single_gaussian_decoder_forward(xl.astype(jnp.bfloat16), w1b, b1b, w2b, b2b,
                                        out_dtype=jnp.float32))
    assert jnp.allclose(out_bf16, ref_fwd(xl), atol=2e-1, rtol=2e-1), "bf16 path mismatch"

    # 6) compute_loss (plain-JAX glue around the Pallas forward) vs reference.
    red = jax.random.normal(kr, (batch, output_dim), dtype=jnp.float32)
    loss = jax.block_until_ready(compute_loss(x, red, w1, b1, w2, b2, log_std))
    m_ref = ref_fwd(x)
    lp_ref = (-0.5 * (red - m_ref) ** 2 / jnp.exp(2 * log_std)
              - log_std - 0.5 * jnp.log(2 * jnp.pi))
    loss_ref = -jnp.mean(jnp.sum(lp_ref, axis=1))
    assert jnp.allclose(loss, loss_ref, atol=1e-5, rtol=1e-5), "loss mismatch"

    print("KERNEL_OK")
</pallas_src>

<mosaic_0001>
module attributes {stable_mosaic.version = 11 : i64} {
  func.func @_forward_kernel(%arg0: i32, %arg1: memref<8x32xf32, #tpu.memory_space<vmem>>, %arg2: memref<32x32xf32, #tpu.memory_space<vmem>>, %arg3: memref<1x32xf32, #tpu.memory_space<vmem>>, %arg4: memref<32x8xf32, #tpu.memory_space<vmem>>, %arg5: memref<1x8xf32, #tpu.memory_space<vmem>>, %arg6: memref<8x8xf32, #tpu.memory_space<vmem>>) attributes {dimension_semantics = [#tpu.dimension_semantics<parallel>], iteration_bounds = array<i64: 1>, scalar_prefetch = 0 : i64, scratch_operands = 0 : i64, tpu.core_type = #tpu.core_type<tc>, window_params = [{transform_indices = @transform_0, window_bounds = array<i64: 8, 32>}, {pipeline_mode = #tpu.pipeline_mode<synchronous>, transform_indices = @transform_1, window_bounds = array<i64: 32, 32>}, {pipeline_mode = #tpu.pipeline_mode<synchronous>, transform_indices = @transform_2, window_bounds = array<i64: 1, 32>}, {pipeline_mode = #tpu.pipeline_mode<synchronous>, transform_indices = @transform_3, window_bounds = array<i64: 32, 8>}, {pipeline_mode = #tpu.pipeline_mode<synchronous>, transform_indices = @transform_4, window_bounds = array<i64: 1, 8>}, {transform_indices = @transform_5, window_bounds = array<i64: 8, 8>}]} {
    %c0 = arith.constant 0 : index
    %c0_0 = arith.constant 0 : index
    %0 = vector.load %arg2[%c0, %c0_0] : memref<32x32xf32, #tpu.memory_space<vmem>>, vector<32x32xf32>
    %c0_1 = arith.constant 0 : index
    %c0_2 = arith.constant 0 : index
    %1 = vector.load %arg4[%c0_1, %c0_2] : memref<32x8xf32, #tpu.memory_space<vmem>>, vector<32x8xf32>
    %c0_3 = arith.constant 0 : index
    %c0_4 = arith.constant 0 : index
    %2 = vector.load %arg1[%c0_3, %c0_4] : memref<8x32xf32, #tpu.memory_space<vmem>>, vector<8x32xf32>
    %cst = arith.constant dense<0.000000e+00> : vector<8x32xf32>
    %3 = tpu.matmul %2, %0, %cst {dimension_numbers = #tpu.dot_dimension_numbers<[1], [0], [0], [1], [0, 0, 1, 1], [], []>} : vector<8x32xf32>, vector<32x32xf32>, vector<8x32xf32> -> vector<8x32xf32>
    %c0_5 = arith.constant 0 : index
    %c0_6 = arith.constant 0 : index
    %4 = vector.load %arg3[%c0_5, %c0_6] : memref<1x32xf32, #tpu.memory_space<vmem>>, vector<1x32xf32>
    %5 = vector.broadcast %4 : vector<1x32xf32> to vector<8x32xf32>
    %6 = arith.addf %3, %5 : vector<8x32xf32>
    %7 = math.tanh %6 : vector<8x32xf32>
    %cst_7 = arith.constant dense<0.000000e+00> : vector<8x8xf32>
    %8 = tpu.matmul %7, %1, %cst_7 {dimension_numbers = #tpu.dot_dimension_numbers<[1], [0], [0], [1], [0, 0, 1, 1], [], []>} : vector<8x32xf32>, vector<32x8xf32>, vector<8x8xf32> -> vector<8x8xf32>
    %c0_8 = arith.constant 0 : index
    %c0_9 = arith.constant 0 : index
    %9 = vector.load %arg5[%c0_8, %c0_9] : memref<1x8xf32, #tpu.memory_space<vmem>>, vector<1x8xf32>
    %10 = vector.broadcast %9 : vector<1x8xf32> to vector<8x8xf32>
    %11 = arith.addf %8, %10 : vector<8x8xf32>
    %c0_10 = arith.constant 0 : index
    %c0_11 = arith.constant 0 : index
    %12 = vector.load %arg6[%c0_10, %c0_11] : memref<8x8xf32, #tpu.memory_space<vmem>>, vector<8x8xf32>
    tpu.vector_store %arg6[%c0_10, %c0_11], %11 {strides = array<i32>} : memref<8x8xf32, #tpu.memory_space<vmem>>, vector<8x8xf32>,
    return
  }
  func.func @transform_0(%arg0: i32) -> (i32, i32) {
    %c0_i32 = arith.constant 0 : i32
    %c0_i32_0 = arith.constant 0 : i32
    return %arg0, %c0_i32 : i32, i32
  }
  func.func @transform_1(%arg0: i32) -> (i32, i32) {
    %c0_i32 = arith.constant 0 : i32
    %c0_i32_0 = arith.constant 0 : i32
    %c0_i32_1 = arith.constant 0 : i32
    return %c0_i32, %c0_i32_0 : i32, i32
  }
  func.func @transform_2(%arg0: i32) -> (i32, i32) {
    %c0_i32 = arith.constant 0 : i32
    %c0_i32_0 = arith.constant 0 : i32
    %c0_i32_1 = arith.constant 0 : i32
    return %c0_i32, %c0_i32_0 : i32, i32
  }
  func.func @transform_3(%arg0: i32) -> (i32, i32) {
    %c0_i32 = arith.constant 0 : i32
    %c0_i32_0 = arith.constant 0 : i32
    %c0_i32_1 = arith.constant 0 : i32
    return %c0_i32, %c0_i32_0 : i32, i32
  }
  func.func @transform_4(%arg0: i32) -> (i32, i32) {
    %c0_i32 = arith.constant 0 : i32
    %c0_i32_0 = arith.constant 0 : i32
    %c0_i32_1 = arith.constant 0 : i32
    return %c0_i32, %c0_i32_0 : i32, i32
  }
  func.func @transform_5(%arg0: i32) -> (i32, i32) {
    %c0_i32 = arith.constant 0 : i32
    %c0_i32_0 = arith.constant 0 : i32
    return %arg0, %c0_i32 : i32, i32
  }
}

</mosaic_0001>

<bundles_post_ra>
// kernel: tpu_custom_call.1
= control target key start
LH: loop header
LB: loop body
LE: loop exit
PB: predicated region body
PF: predicated region fallthrough
CT: control target
= control target key end

     0   :  { %s206_s0 = inlined_call_operand.vmem [shape: f32[8,32], index: 0, kind: input, shape index: {}]   ;;  %s207_s1 = inlined_call_operand.vmem [shape: f32[32,32], index: 1, kind: input, shape index: {}]   ;;  %s208_s2 = inlined_call_operand.vmem [shape: f32[1,32], index: 2, kind: input, shape index: {}]   ;;  %s209_s3 = inlined_call_operand.vmem [shape: f32[32,8], index: 3, kind: input, shape index: {}]   ;;  %s210_s4 = inlined_call_operand.vmem [shape: f32[1,8], index: 4, kind: input, shape index: {}]   ;;  %s211_s5 = inlined_call_operand.hbm [shape: f32[8,8], index: 5, kind: output, shape index: {}]  }
   0x1   :  { %v24_v0 = vld [vmem:[%s207_s1 + $0x18] sm:$0xff]  ;;  %v23_v1 = vld [vmem:[%s207_s1 + $0x10] sm:$0xff]  ;;  %v22_v2 = vld [vmem:[%s207_s1 + $0x8] sm:$0xff] }
   0x2   :  { %50 = vmatpush.msra.mxu0 %v24_v0 }
   0x3   :  { %10 = vsyncpa [#allocation3], 0  ;;  %v21_v3 = vld [vmem:[%s207_s1] sm:$0xff]  ;;  %vm34_vm0 = vcmask 261120   ;;  %v28_v5 = vld [vmem:[%s209_s3 + $0x18] sm:$0xff]  ;;  %s137_s13 = smov [#allocation2]  }
   0x4   :  { %51 = vmatpush.msra.mxu0 %v23_v1  ;;  %v29_v4 = vld [vmem:[%s206_s0] sm:$0xff]  ;;  %78 = vmatpush.msra.mxu1 %v28_v5  ;;  %v27_v6 = vld [vmem:[%s209_s3 + $0x10] sm:$0xff]  ;;  %v26_v7 = vld [vmem:[%s209_s3 + $0x8] sm:$0xff]  ;;  %s93_s14 = sshll.u32 %s137_s13, 4  ;;  %s95_s16 = sshll.u32 %s211_s5, 4  ;;  %vm86_vm1 = vcmask 64512   ;;  %s94_s14 = int_to_ptr.vmem [resolvable:$true] %s93_s14  ;;  %s96_s16 = int_to_ptr.hbm [resolvable:$true] %s95_s16 }
   0x5   :  { %v25_v8 = vld [vmem:[%s209_s3] sm:$0xff] }
   0x6   :  { %52 = vmatpush.msra.mxu0 %v22_v2  ;;  %79 = vmatpush.msra.mxu1 %v27_v6  ;;  %v107_v9 = vld [vmem:[%s208_s2] ss:$0 sm:$0xff] }
   0x7   :  { %v108_v13 = vld [vmem:[%s210_s4] ss:$0 sm:$0xff] }
   0x8   :  { %53 = vmatpush.msra.mxu0 %v21_v3  ;;  %80 = vmatpush.msra.mxu1 %v26_v7 }
   0x9   :  { %104 = vmatmul.msk.f32.vlgmr.msra.gmra.mxu0 %vm34_vm0, %v29_v4 }
   0xa   :  { %81 = vmatpush.msra.mxu1 %v25_v8 }
  0x86   :  { %v55_v10 = vpop.f32.mrf.mxu0 }
  0x87   :  { %v56_v11 = vadd.f32 %v107_v9, %v55_v10 }
  0x89   :  { %109 = vtanh.f32 %v56_v11 }
  0x8f   :  { %v110_v12 = vpop.eup %109 }
  0x90   :  { %105 = vmatmul.msk.f32.vlgmr.msra.gmra.mxu1 %vm34_vm0, %v110_v12 }
 0x10d   :  { %v83_v14 = vpop.f32.mrf.mxu1 }
 0x10e   :  { %v84_v15 = vadd.f32 %v108_v13, %v83_v14 }
 0x110   :  { %87 = vst.msk [vmem:[#allocation2] sm:$0xff] %vm86_vm1, %v84_v15 }
 0x111   :  { %98 = dma.vmem_to_hbm [thread:$0]  %s94_s14, 128, %s96_s16, [#allocation3]  }
 0x112   :  { %135 = dma.done.wait [#allocation3], 128  }
 0x113   :  { %136 = vsyncadd [#allocation3], 4294967168 }
 0x114   :  { %103 = vsyncpa [#allocation3], 1 }

</bundles_post_ra>
